<compile_context>
chip_gen: v7x
topology: tpu7x:2x2x1
jax: 0.10.0
libtpu: 0.0.40
codegen_flags: <defaults>
</compile_context>

<pallas_src>
import jax
import jax.numpy as jnp
from jax import lax
from jax.experimental import pallas as pl
from jax.experimental.pallas import tpu as pltpu

_LANES = 128
_SUBLANES = 8
_MAX_BLOCK_ROWS = 8192   # (8192,128) f32 = 4 MiB / input / buffer
_CHUNK_ROWS = 64         # in-kernel streaming chunk (bounds live vregs to ~40)


def _cdiv(a: int, b: int) -> int:
    return -(-a // b)


def _round_up(a: int, b: int) -> int:
    return _cdiv(a, b) * b


def _make_kernel(rows, block_rows, blocks_per_split, chunk_rows, needs_tail):
    """Build the sum-of-abs-diff kernel with all sizes closed over statically."""
    num_chunks = block_rows // chunk_rows
    num_full_blocks = rows // block_rows          # blocks guaranteed fully valid
    unroll = max(1, min(4, num_chunks))

    def fold(d):
        # (chunk_rows, 128) f32 -> (8, 128): pure elementwise VPU adds.
        if chunk_rows == _SUBLANES:
            return d
        return jnp.sum(d.reshape(chunk_rows // _SUBLANES, _SUBLANES, _LANES), axis=0)

    def kernel(real_ref, cycled_ref, out_ref):
        s = pl.program_id(0)                      # split (TensorCore) axis
        i = pl.program_id(1)                      # reduction axis ("arbitrary")
        g = s * blocks_per_split + i              # global (unclamped) block index

        @pl.when(i == 0)
        def _init():
            out_ref[...] = jnp.zeros_like(out_ref)

        def load_chunk(k):
            off = pl.multiple_of(k * chunk_rows, chunk_rows)
            r = real_ref[pl.ds(off, chunk_rows), :]
            c = cycled_ref[pl.ds(off, chunk_rows), :]
            # subtract/abs in the native (possibly bf16) dtype; widen only to
            # accumulate.
            return off, jnp.abs(r - c).astype(jnp.float32)

        def full_body(k, acc):
            _, d = load_chunk(k)
            return acc + fold(d)

        def run_full():
            acc = lax.fori_loop(0, num_chunks, full_body,
                                jnp.zeros((_SUBLANES, _LANES), jnp.float32),
                                unroll=unroll)
            out_ref[...] += acc

        if not needs_tail:
            run_full()
            return

        if num_full_blocks > 0:
            @pl.when(g < num_full_blocks)
            def _full():
                run_full()

        @pl.when(g >= num_full_blocks)
        def _tail():
            # Valid rows in this block; <= 0 for a dummy (clamped) block, in
            # which case everything is masked to zero.
            valid = rows - g * block_rows

            def tail_body(k, acc):
                off, d = load_chunk(k)
                rid = lax.broadcasted_iota(jnp.int32, (chunk_rows, _LANES), 0) + off
                d = jnp.where(rid < valid, d, 0.0)
                return acc + fold(d)

            acc = lax.fori_loop(0, num_chunks, tail_body,
                                jnp.zeros((_SUBLANES, _LANES), jnp.float32),
                                unroll=unroll)
            out_ref[...] += acc

    return kernel


def cycle_loss(real: jax.Array, cycled: jax.Array, scale: float) -> jax.Array:
    """mean(|real - cycled|) * scale, computed with a Pallas TPU reduction."""
    assert real.shape == cycled.shape, (real.shape, cycled.shape)
    n = real.size
    if n == 0:
        return jnp.float32(0.0)

    # Uniform floating dtypes (no-op for the usual f32/bf16 image tensors).
    if not jnp.issubdtype(real.dtype, jnp.floating):
        real = real.astype(jnp.float32)
    if not jnp.issubdtype(cycled.dtype, jnp.floating):
        cycled = cycled.astype(jnp.float32)
    if real.dtype != cycled.dtype:
        dt = jnp.promote_types(real.dtype, cycled.dtype)
        real, cycled = real.astype(dt), cycled.astype(dt)

    r_flat = real.reshape(-1)
    c_flat = cycled.reshape(-1)

    rows = n // _LANES
    lane_tail = n - rows * _LANES

    # <128-element ragged lane tail: one tiny plain-jnp op (no full-array pad).
    tail_sum = None
    if lane_tail:
        tail_sum = jnp.sum(
            jnp.abs(r_flat[rows * _LANES:] - c_flat[rows * _LANES:]).astype(jnp.float32))

    if rows == 0:
        # Input smaller than one lane row: pure-jnp fallback.
        total = tail_sum
    else:
        # Lane-aligned prefix (free reshape when n % 128 == 0).
        if lane_tail:
            r2d = r_flat[:rows * _LANES].reshape(rows, _LANES)
            c2d = c_flat[:rows * _LANES].reshape(rows, _LANES)
        else:
            r2d = r_flat.reshape(rows, _LANES)
            c2d = c_flat.reshape(rows, _LANES)

        block_rows = min(_MAX_BLOCK_ROWS, _round_up(rows, _SUBLANES))
        chunk_rows = _CHUNK_ROWS if block_rows % _CHUNK_ROWS == 0 else _SUBLANES
        num_blocks = _cdiv(rows, block_rows)
        splits = 2 if num_blocks >= 2 else 1      # v7x: 2 TCs; harmless elsewhere
        blocks_per_split = _cdiv(num_blocks, splits)
        total_blocks = splits * blocks_per_split  # may exceed num_blocks by <= 1
        num_full_blocks = rows // block_rows
        needs_tail = total_blocks > num_full_blocks

        if total_blocks > num_blocks:
            # Clamp dummy trailing block(s) onto the last real block; the kernel
            # masks their contribution to zero (no HBM padding copy needed).
            idx_map = lambda s, i: (jnp.minimum(s * blocks_per_split + i,
                                                num_blocks - 1), 0)
        else:
            idx_map = lambda s, i: (s * blocks_per_split + i, 0)

        in_spec = pl.BlockSpec((block_rows, _LANES), idx_map)
        bytes_per_elem = real.dtype.itemsize + cycled.dtype.itemsize
        block_bytes = block_rows * _LANES * bytes_per_elem
        # Cover the double-buffered pipeline explicitly; stays well under the
        # 64 MiB physical VMEM of v7x (and the 128 MiB of v5e/v6e).
        vmem_limit = max(32 * 1024 * 1024, 2 * block_bytes + 8 * 1024 * 1024)

        kernel = _make_kernel(rows, block_rows, blocks_per_split, chunk_rows,
                              needs_tail)

        partials = pl.pallas_call(
            kernel,
            out_shape=jax.ShapeDtypeStruct((splits * _SUBLANES, _LANES),
                                           jnp.float32),
            grid_spec=pltpu.PrefetchScalarGridSpec(
                num_scalar_prefetch=0,
                grid=(splits, blocks_per_split),
                in_specs=[in_spec, in_spec],
                out_specs=pl.BlockSpec((_SUBLANES, _LANES), lambda s, i: (s, 0)),
            ),
            compiler_params=pltpu.CompilerParams(
                dimension_semantics=("parallel", "arbitrary"),
                vmem_limit_bytes=vmem_limit,
            ),
            cost_estimate=pl.CostEstimate(
                flops=3 * n,
                transcendentals=0,
                bytes_accessed=rows * _LANES * bytes_per_elem,
            ),
        )(r2d, c2d)

        total = jnp.sum(partials, dtype=jnp.float32)
        if tail_sum is not None:
            total = total + tail_sum

    return (total / jnp.float32(n)) * jnp.float32(scale)


if __name__ == "__main__":
    key = jax.random.PRNGKey(0)
    k_real, k_cycled = jax.random.split(key)
    # Small NCHW images consistent with the CycleGAN module: batch=2, C=4, 16x16.
    real = jax.random.normal(k_real, (2, 4, 16, 16), dtype=jnp.float32)
    cycled = jax.random.normal(k_cycled, (2, 4, 16, 16), dtype=jnp.float32)
    scale = 10.0

    loss = cycle_loss(real, cycled, scale)
    jax.block_until_ready(loss)

    # Reference (plain JAX): mean(|real - cycled|) * scale.
    ref = jnp.mean(jnp.abs(real - cycled)) * scale
    assert jnp.allclose(loss, ref, rtol=1e-5, atol=1e-6), (loss, ref)

    print("KERNEL_OK")
</pallas_src>

<mosaic_0001>
module attributes {stable_mosaic.version = 11 : i64} {
  func.func @kernel(%arg0: i32, %arg1: i32, %arg2: memref<16x128xf32, #tpu.memory_space<vmem>>, %arg3: memref<16x128xf32, #tpu.memory_space<vmem>>, %arg4: memref<8x128xf32, #tpu.memory_space<vmem>>) attributes {dimension_semantics = [#tpu.dimension_semantics<parallel>, #tpu.dimension_semantics<arbitrary>], iteration_bounds = array<i64: 1, 1>, scalar_prefetch = 0 : i64, scratch_operands = 0 : i64, tpu.core_type = #tpu.core_type<tc>, window_params = [{transform_indices = @transform_0, window_bounds = array<i64: 16, 128>}, {transform_indices = @transform_1, window_bounds = array<i64: 16, 128>}, {transform_indices = @transform_2, window_bounds = array<i64: 8, 128>}]} {
    %c0_i32 = arith.constant 0 : i32
    %0 = arith.cmpi eq, %arg1, %c0_i32 : i32
    %1 = arith.extui %0 : i1 to i32
    %c0_i32_0 = arith.constant 0 : i32
    %2 = arith.cmpi ne, %1, %c0_i32_0 : i32
    scf.if %2 {
      %cst_10 = arith.constant 0.000000e+00 : f32
      %25 = vector.broadcast %cst_10 : f32 to vector<8x128xf32>
      %c0_11 = arith.constant 0 : index
      %c0_12 = arith.constant 0 : index
      %26 = vector.load %arg4[%c0_11, %c0_12] : memref<8x128xf32, #tpu.memory_space<vmem>>, vector<8x128xf32>
      tpu.vector_store %arg4[%c0_11, %c0_12], %25 {strides = array<i32>} : memref<8x128xf32, #tpu.memory_space<vmem>>, vector<8x128xf32>,
    } else {
    }
    %cst = arith.constant 0.000000e+00 : f32
    %3 = vector.broadcast %cst : f32 to vector<8x128xf32>
    %c0_i32_1 = arith.constant 0 : i32
    %c8_i32 = arith.constant 8 : i32
    %4 = arith.muli %c0_i32_1, %c8_i32 : i32
    %5 = tpu.assume_multiple %4, 8 : i32
    %6 = arith.index_cast %5 : i32 to index
    %c0 = arith.constant 0 : index
    %7 = vector.load %arg2[%6, %c0] : memref<16x128xf32, #tpu.memory_space<vmem>>, vector<8x128xf32>
    %8 = arith.index_cast %5 : i32 to index
    %c0_2 = arith.constant 0 : index
    %9 = vector.load %arg3[%8, %c0_2] : memref<16x128xf32, #tpu.memory_space<vmem>>, vector<8x128xf32>
    %10 = arith.subf %7, %9 : vector<8x128xf32>
    %11 = math.absf %10 : vector<8x128xf32>
    %12 = arith.addf %3, %11 : vector<8x128xf32>
    %c1_i32 = arith.constant 1 : i32
    %c8_i32_3 = arith.constant 8 : i32
    %13 = arith.muli %c1_i32, %c8_i32_3 : i32
    %14 = tpu.assume_multiple %13, 8 : i32
    %15 = arith.index_cast %14 : i32 to index
    %c0_4 = arith.constant 0 : index
    %16 = vector.load %arg2[%15, %c0_4] : memref<16x128xf32, #tpu.memory_space<vmem>>, vector<8x128xf32>
    %17 = arith.index_cast %14 : i32 to index
    %c0_5 = arith.constant 0 : index
    %18 = vector.load %arg3[%17, %c0_5] : memref<16x128xf32, #tpu.memory_space<vmem>>, vector<8x128xf32>
    %19 = arith.subf %16, %18 : vector<8x128xf32>
    %20 = math.absf %19 : vector<8x128xf32>
    %21 = arith.addf %12, %20 : vector<8x128xf32>
    %c2_i32 = arith.constant 2 : i32
    %c0_6 = arith.constant 0 : index
    %c0_7 = arith.constant 0 : index
    %22 = vector.load %arg4[%c0_6, %c0_7] : memref<8x128xf32, #tpu.memory_space<vmem>>, vector<8x128xf32>
    %23 = arith.addf %22, %21 : vector<8x128xf32>
    %c0_8 = arith.constant 0 : index
    %c0_9 = arith.constant 0 : index
    %24 = vector.load %arg4[%c0_8, %c0_9] : memref<8x128xf32, #tpu.memory_space<vmem>>, vector<8x128xf32>
    tpu.vector_store %arg4[%c0_8, %c0_9], %23 {strides = array<i32>} : memref<8x128xf32, #tpu.memory_space<vmem>>, vector<8x128xf32>,
    return
  }
  func.func @transform_0(%arg0: i32, %arg1: i32) -> (i32, i32) {
    %c1_i32 = arith.constant 1 : i32
    %0 = arith.muli %arg0, %c1_i32 : i32
    %1 = arith.addi %0, %arg1 : i32
    %c0_i32 = arith.constant 0 : i32
    %c0_i32_0 = arith.constant 0 : i32
    return %1, %c0_i32 : i32, i32
  }
  func.func @transform_1(%arg0: i32, %arg1: i32) -> (i32, i32) {
    %c1_i32 = arith.constant 1 : i32
    %0 = arith.muli %arg0, %c1_i32 : i32
    %1 = arith.addi %0, %arg1 : i32
    %c0_i32 = arith.constant 0 : i32
    %c0_i32_0 = arith.constant 0 : i32
    return %1, %c0_i32 : i32, i32
  }
  func.func @transform_2(%arg0: i32, %arg1: i32) -> (i32, i32) {
    %c0_i32 = arith.constant 0 : i32
    %c0_i32_0 = arith.constant 0 : i32
    return %arg0, %c0_i32 : i32, i32
  }
}

</mosaic_0001>

<bundles_post_ra>
// kernel: tpu_custom_call.1
= control target key start
LH: loop header
LB: loop body
LE: loop exit
PB: predicated region body
PF: predicated region fallthrough
CT: control target
= control target key end

     0   :  { %7 = vsyncpa [#allocation3], 0  ;;  %s222_s0 = inlined_call_operand.hbm [shape: f32[16,128], index: 0, kind: input, shape index: {}]   ;;  %s223_s1 = inlined_call_operand.hbm [shape: f32[16,128], index: 1, kind: input, shape index: {}]   ;;  %s224_s2 = inlined_call_operand.hbm [shape: f32[8,128], index: 2, kind: output, shape index: {}]  }
   0x1   :  { %8 = vsyncpa [#allocation6], 0 }
   0x2   :  { %9 = vsyncpa [#allocation4], 0  ;;  %s166_s9 = smov [#allocation2]   ;;  %s94_s13 = scalar_lea.hbm %s222_s0, 256 }
   0x3   :  { %s19_s10 = sshll.u32 %s166_s9, 4  ;;  %p95_p0 = scmp.ne.s32.totalorder %s222_s0, %s94_s13  ;;  %s20_s10 = int_to_ptr.vmem [resolvable:$true] %s19_s10 }
   0x4   :  { %p98_p1 = scmp.lt.u32.totalorder %s94_s13, %s222_s0 }
   0x6   :  { %p100_p2 = pnand %p98_p1, %p95_p0 }
   0x8   :  { %103 = shalt.err (!%p100_p2)
}
   0x9   :  { %s104_s18 = scalar_lea.vmem %s20_s10, 256  ;;  %p109_p4 = scmp.lt.s32.totalorder %s20_s10, %s20_s10 }
   0xa   :  { %p105_p3 = scmp.ne.s32.totalorder %s20_s10, %s104_s18  ;;  %p110_p5 = scmp.lt.s32.totalorder %s104_s18, %s104_s18 }
   0xc   :  { %p111_p6 = por %p110_p5, %p109_p4 }
   0xe   :  { %p112_p7 = pnand %p111_p6, %p105_p3 }
  0x10   :  { %115 = shalt.err (!%p112_p7)
}
  0x11   :  { %s167_s19 = smov 128   ;;  %s168_s20 = smov 8  }
  0x12   :  { %25 = dma.hbm_to_vmem [thread:$0]  %s222_s0, 256, %s20_s10, [#allocation3], %s167_s19, %s167_s19, %s168_s20  }
  0x13   :  { %s169_s23 = smov [#allocation5]   ;;  %s116_s27 = scalar_lea.hbm %s223_s1, 256 }
  0x14   :  { %s35_s24 = sshll.u32 %s169_s23, 4  ;;  %p117_p8 = scmp.ne.s32.totalorder %s223_s1, %s116_s27  ;;  %s36_s24 = int_to_ptr.vmem [resolvable:$true] %s35_s24 }
  0x15   :  { %p120_p9 = scmp.lt.u32.totalorder %s116_s27, %s223_s1 }
  0x17   :  { %p122_p10 = pnand %p120_p9, %p117_p8 }
  0x19   :  { %125 = shalt.err (!%p122_p10)
}
  0x1a   :  { %s126_s4 = scalar_lea.vmem %s36_s24, 256  ;;  %p131_p12 = scmp.lt.s32.totalorder %s36_s24, %s36_s24 }
  0x1b   :  { %p127_p11 = scmp.ne.s32.totalorder %s36_s24, %s126_s4  ;;  %p132_p13 = scmp.lt.s32.totalorder %s126_s4, %s126_s4 }
  0x1d   :  { %p133_p0 = por %p132_p13, %p131_p12 }
  0x1f   :  { %p134_p1 = pnand %p133_p0, %p127_p11 }
  0x21   :  { %137 = shalt.err (!%p134_p1)
}
  0x22   :  { %41 = dma.hbm_to_vmem [thread:$0]  %s223_s1, 256, %s36_s24, [#allocation6], %s167_s19, %s167_s19, %s168_s20  }
  0x23   :  { %160 = dma.done.wait [#allocation3], 256  }
  0x24   :  { %161 = vsyncadd [#allocation3], 4294967040 }
  0x25   :  { %162 = dma.done.wait [#allocation6], 256  }
  0x26   :  { %163 = vsyncadd [#allocation6], 4294967040  ;;  %v57_v0 = vld [vmem:[#allocation2] sm:$0xff]  ;;  %v58_v1 = vld [vmem:[#allocation5] sm:$0xff]  ;;  %s170_s6 = smov [#allocation7]  }
  0x27   :  { %v63_v2 = vld [vmem:[#allocation2 + $0x8] sm:$0xff]  ;;  %v59_v3 = vsub.f32 %v57_v0, %v58_v1  ;;  %v65_v4 = vld [vmem:[#allocation5 + $0x8] sm:$0xff]  ;;  %s78_s7 = sshll.u32 %s170_s6, 4  ;;  %s79_s7 = int_to_ptr.vmem [resolvable:$true] %s78_s7 }
  0x28   :  { %v66_v5 = vsub.f32 %v63_v2, %v65_v4  ;;  %s138_s8 = scalar_lea.vmem %s79_s7, 128  ;;  %p143_p3 = scmp.lt.s32.totalorder %s79_s7, %s79_s7 }
  0x29   :  { %v60_v6 = vand.u32 2147483647, %v59_v3  ;;  %p139_p2 = scmp.ne.s32.totalorder %s79_s7, %s138_s8  ;;  %p144_p4 = scmp.lt.s32.totalorder %s138_s8, %s138_s8 }
  0x2a   :  { %v67_v7 = vand.u32 2147483647, %v66_v5 }
  0x2b   :  { %p145_p5 = por %p144_p4, %p143_p3 }
  0x2c   :  { %v68_v8 = vadd.f32 %v67_v7, %v60_v6 }
  0x2d   :  { %p146_p6 = pnand %p145_p5, %p139_p2 }
  0x2e   :  { %71 = vst [vmem:[#allocation7] sm:$0xff] %v68_v8 }
  0x2f   :  { %149 = shalt.err (!%p146_p6)
}
  0x30   :  { %s150_s10 = scalar_lea.hbm %s224_s2, 128 }
  0x31   :  { %p151_p7 = scmp.ne.s32.totalorder %s224_s2, %s150_s10  ;;  %p154_p8 = scmp.lt.u32.totalorder %s150_s10, %s224_s2 }
  0x33   :  { %p156_p9 = pnand %p154_p8, %p151_p7 }
  0x35   :  { %159 = shalt.err (!%p156_p9)
}
  0x36   :  { %81 = dma.vmem_to_hbm [thread:$0]  %s79_s7, 128, %s224_s2, [#allocation4]  }
  0x37   :  { %164 = dma.done.wait [#allocation4], 128  }
  0x38   :  { %165 = vsyncadd [#allocation4], 4294967168 }
  0x39   :  { %85 = vsyncpa [#allocation3], 1 }
  0x3a   :  { %86 = vsyncpa [#allocation6], 1 }
  0x3b   :  { %87 = vsyncpa [#allocation4], 1 }

</bundles_post_ra>
